<compile_context>
chip_gen: v5e
topology: v5e:2x2
jax: 0.10.0
libtpu: 0.0.40
codegen_flags: <defaults>
</compile_context>

<pallas_src>
import functools

import jax
import jax.numpy as jnp
from jax.experimental import pallas as pl
from jax.experimental.pallas import tpu as pltpu


# ----------------------------------------------------------------------------
# Fused kernel:
#   H1        = relu( A @ X @ W1 + b1 )                     (GCN layer 1)
#   A_t       = onehot(targets) @ A                         (center pooling)
#   E         = relu( A_t @ H1 @ W2 + b2 )                  (GCN layer 2, target rows)
#   E_n       = E / max(||E||_2, 1e-12)                     (F.normalize, dim=1)
#   logits    = E_n @ Wc + bc                               (classifier; 'norm_feat'
#                                                            is idempotent on unit rows)
# ----------------------------------------------------------------------------
def _fused_deepgnn_kernel(
    tgt_ref,                    # SMEM (T_pad,) int32   (scalar-prefetched targets)
    a_ref, x_ref,               # bf16 (N,N), (N,F)
    w1_ref, b1_ref,             # bf16 (F,Hp),  f32 (1,Hp)
    w2_ref, b2_ref,             # bf16 (Hp,Hp), f32 (1,Hp)
    wc_ref, bc_ref,             # bf16 (Hp,Cp), f32 (1,Cp)
    logits_ref, emb_ref,        # f32 (Tp,Cp), f32 (Tp,Hp)
    *, transform_first,
):
    a = a_ref[...]
    x = x_ref[...]
    n = a_ref.shape[0]
    t_pad = logits_ref.shape[0]

    # ---- GCN layer 1: h1 = relu(A @ X @ W1 + b1) ---------------------------
    if transform_first:   # F_in > H_pad -> transform features before aggregating
        xw = jnp.dot(x, w1_ref[...], preferred_element_type=jnp.float32)
        h1 = jnp.dot(a, xw.astype(jnp.bfloat16), preferred_element_type=jnp.float32)
    else:                 # aggregate first (cheaper when F_in <= H_pad)
        ax = jnp.dot(a, x, preferred_element_type=jnp.float32)
        h1 = jnp.dot(ax.astype(jnp.bfloat16), w1_ref[...],
                     preferred_element_type=jnp.float32)
    h1 = jnp.maximum(h1 + b1_ref[...], 0.0).astype(jnp.bfloat16)        # (N, Hp)

    # ---- center pooling: one-hot row selection built from SMEM targets -----
    # sel[t, j] = 1 iff j == targets[t]  (padded targets are 0; the extra rows
    # are sliced away in the wrapper).  Built with pure VPU compare/select.
    row = jax.lax.broadcasted_iota(jnp.int32, (t_pad, n), 0)
    col = jax.lax.broadcasted_iota(jnp.int32, (t_pad, n), 1)
    tgt_b = jnp.zeros((t_pad, n), jnp.int32)
    for t in range(t_pad):                      # T_pad is small & static -> unrolled
        tgt_b = tgt_b + jnp.where(row == t, tgt_ref[t], 0)
    sel = (col == tgt_b).astype(jnp.bfloat16)                           # (Tp, N)
    a_t = jnp.dot(sel, a, preferred_element_type=jnp.float32)           # A[targets, :]
    a_t = a_t.astype(jnp.bfloat16)

    # ---- GCN layer 2 on target rows only: relu(A_t @ H1 @ W2 + b2) ---------
    ah = jnp.dot(a_t, h1, preferred_element_type=jnp.float32).astype(jnp.bfloat16)
    h2 = jnp.dot(ah, w2_ref[...], preferred_element_type=jnp.float32) + b2_ref[...]
    h2 = jnp.maximum(h2, 0.0)                                           # (Tp, Hp) f32

    # ---- ResPool output -> F.normalize(p=2, dim=1) (torch eps = 1e-12) -----
    ssq = jnp.sum(h2 * h2, axis=-1, keepdims=True)
    e_n = h2 * jax.lax.rsqrt(jnp.maximum(ssq, 1e-24))   # == x / max(||x||, 1e-12)
    emb_ref[...] = e_n

    # ---- classifier ('norm_feat' re-normalization is idempotent) -----------
    logits_ref[...] = (
        jnp.dot(e_n.astype(jnp.bfloat16), wc_ref[...],
                preferred_element_type=jnp.float32)
        + bc_ref[...]
    )


# ----------------------------------------------------------------------------
# Wrapper: padding, bf16 casts, single pallas_call.
# ----------------------------------------------------------------------------
def _round_up(v, m):
    return ((v + m - 1) // m) * m


def _pad2d(x, rows, cols, dtype):
    out = jnp.zeros((rows, cols), dtype=dtype)
    return out.at[: x.shape[0], : x.shape[1]].set(x.astype(dtype))


def deep_gnn_forward(feat, adj_norm, targets, params):
    """feat: [N, F] fp32, adj_norm: [N, N] fp32 (D^-1/2 (A+I) D^-1/2), targets: [T] int32."""
    N, F_in = feat.shape
    H = params["w1"].shape[1]
    C = params["wc"].shape[1]
    T = targets.shape[0]

    H_PAD = _round_up(max(H, 128), 128)   # lane-dense hidden dim
    C_PAD = _round_up(max(C, 128), 128)   # lane-dense class dim
    T_PAD = _round_up(max(T, 8), 8)       # sublane-aligned target rows

    # bf16 MXU operands (f32 accumulation in-kernel); zero padding is exact.
    a_bf = adj_norm.astype(jnp.bfloat16)
    x_bf = feat.astype(jnp.bfloat16)
    w1 = _pad2d(params["w1"], F_in, H_PAD, jnp.bfloat16)
    w2 = _pad2d(params["w2"], H_PAD, H_PAD, jnp.bfloat16)
    wc = _pad2d(params["wc"], H_PAD, C_PAD, jnp.bfloat16)
    b1 = _pad2d(params["b1"], 1, H_PAD, jnp.float32)
    b2 = _pad2d(params["b2"], 1, H_PAD, jnp.float32)
    bc = _pad2d(params["bc"], 1, C_PAD, jnp.float32)
    tgt = jnp.zeros((T_PAD,), jnp.int32).at[:T].set(targets.astype(jnp.int32))

    transform_first = F_in > H_PAD  # static under jit

    kernel = functools.partial(_fused_deepgnn_kernel,
                               transform_first=transform_first)

    grid_spec = pltpu.PrefetchScalarGridSpec(
        num_scalar_prefetch=1,
        grid=(1,),
        in_specs=[
            pl.BlockSpec((N, N), lambda i, t: (0, 0)),          # A (bf16)
            pl.BlockSpec((N, F_in), lambda i, t: (0, 0)),        # X (bf16)
            pl.BlockSpec((F_in, H_PAD), lambda i, t: (0, 0)),    # W1
            pl.BlockSpec((1, H_PAD), lambda i, t: (0, 0)),       # b1
            pl.BlockSpec((H_PAD, H_PAD), lambda i, t: (0, 0)),   # W2
            pl.BlockSpec((1, H_PAD), lambda i, t: (0, 0)),       # b2
            pl.BlockSpec((H_PAD, C_PAD), lambda i, t: (0, 0)),   # Wc
            pl.BlockSpec((1, C_PAD), lambda i, t: (0, 0)),       # bc
        ],
        out_specs=[
            pl.BlockSpec((T_PAD, C_PAD), lambda i, t: (0, 0)),   # logits
            pl.BlockSpec((T_PAD, H_PAD), lambda i, t: (0, 0)),   # normalized emb
        ],
    )

    logits_pad, emb_pad = pl.pallas_call(
        kernel,
        out_shape=(
            jax.ShapeDtypeStruct((T_PAD, C_PAD), jnp.float32),
            jax.ShapeDtypeStruct((T_PAD, H_PAD), jnp.float32),
        ),
        grid_spec=grid_spec,
        compiler_params=pltpu.CompilerParams(
            dimension_semantics=("arbitrary",),
            vmem_limit_bytes=48 << 20,
        ),
    )(tgt, a_bf, x_bf, w1, b1, w2, b2, wc, bc)

    logits = logits_pad[:T, :C]
    emb_norm = emb_pad[:T, :H]
    # (pred_subg, emb_subg_ens) -- single-ensemble list
    return logits, [emb_norm]


if __name__ == "__main__":
    # Small shapes consistent with the module
    N = 64      # nodes in the sampled subgraph batch
    F_IN = 32   # dim_feat_smooth (dim_label_smooth = 0)
    H = 32      # arch_gnn['dim']
    C = 8       # num_classes (dim_label_raw)
    T = 8       # number of target nodes ('center' pooling)

    key = jax.random.PRNGKey(0)
    k_feat, k_adj, k1, k2, k3 = jax.random.split(key, 5)

    feat = jax.random.normal(k_feat, (N, F_IN), dtype=jnp.float32)

    # random symmetric adjacency with self loops, GCN-normalized (glue)
    a_raw = (jax.random.uniform(k_adj, (N, N)) < 0.1).astype(jnp.float32)
    a_sym = jnp.clip(a_raw + a_raw.T, 0.0, 1.0) + jnp.eye(N, dtype=jnp.float32)
    deg = jnp.sum(a_sym, axis=1)
    d_inv_sqrt = 1.0 / jnp.sqrt(deg)
    adj_norm = a_sym * d_inv_sqrt[:, None] * d_inv_sqrt[None, :]

    targets = jnp.arange(T, dtype=jnp.int32) * (N // T)

    def lin_init(k, din, dout):
        kw, _ = jax.random.split(k)
        scale = jnp.sqrt(2.0 / (din + dout)).astype(jnp.float32)
        w = jax.random.normal(kw, (din, dout), dtype=jnp.float32) * scale
        b = jnp.zeros((1, dout), dtype=jnp.float32)
        return w, b

    w1, b1 = lin_init(k1, F_IN, H)   # GCN layer 1
    w2, b2 = lin_init(k2, H, H)      # GCN layer 2
    wc, bc = lin_init(k3, H, C)      # classifier (single MLP layer, act='I')
    params = {"w1": w1, "b1": b1, "w2": w2, "b2": b2, "wc": wc, "bc": bc}

    fwd = jax.jit(deep_gnn_forward)
    logits, emb_ens = fwd(feat, adj_norm, targets, params)
    jax.block_until_ready(logits)
    jax.block_until_ready(emb_ens[0])

    assert logits.shape == (T, C)
    assert emb_ens[0].shape == (T, H)

    # fp32 pure-JAX reference (gates the bf16 MXU casts)
    def reference(feat, adj, targets, p):
        h1 = jax.nn.relu(adj @ feat @ p["w1"] + p["b1"])
        h2 = jax.nn.relu(adj @ h1 @ p["w2"] + p["b2"])
        e = h2[targets]
        e = e / jnp.maximum(jnp.linalg.norm(e, axis=1, keepdims=True), 1e-12)
        return e @ p["wc"] + p["bc"], e

    ref_logits, ref_emb = reference(feat, adj_norm, targets, params)
    assert float(jnp.max(jnp.abs(logits - ref_logits))) < 5e-2
    assert float(jnp.max(jnp.abs(emb_ens[0] - ref_emb))) < 5e-2

    print("KERNEL_OK")
</pallas_src>

<mosaic_0001>
module attributes {stable_mosaic.version = 11 : i64} {
  func.func @_fused_deepgnn_kernel(%arg0: i32, %arg1: memref<8xi32, #tpu.memory_space<smem>>, %arg2: memref<64x64xbf16, #tpu.memory_space<vmem>>, %arg3: memref<64x32xbf16, #tpu.memory_space<vmem>>, %arg4: memref<32x128xbf16, #tpu.memory_space<vmem>>, %arg5: memref<1x128xf32, #tpu.memory_space<vmem>>, %arg6: memref<128x128xbf16, #tpu.memory_space<vmem>>, %arg7: memref<1x128xf32, #tpu.memory_space<vmem>>, %arg8: memref<128x128xbf16, #tpu.memory_space<vmem>>, %arg9: memref<1x128xf32, #tpu.memory_space<vmem>>, %arg10: memref<8x128xf32, #tpu.memory_space<vmem>>, %arg11: memref<8x128xf32, #tpu.memory_space<vmem>>) attributes {dimension_semantics = [#tpu.dimension_semantics<arbitrary>], iteration_bounds = array<i64: 1>, scalar_prefetch = 1 : i64, scratch_operands = 0 : i64, tpu.core_type = #tpu.core_type<tc>, window_params = [{pipeline_mode = #tpu.pipeline_mode<synchronous>, transform_indices = @transform_0, window_bounds = array<i64: 64, 64>}, {pipeline_mode = #tpu.pipeline_mode<synchronous>, transform_indices = @transform_1, window_bounds = array<i64: 64, 32>}, {pipeline_mode = #tpu.pipeline_mode<synchronous>, transform_indices = @transform_2, window_bounds = array<i64: 32, 128>}, {pipeline_mode = #tpu.pipeline_mode<synchronous>, transform_indices = @transform_3, window_bounds = array<i64: 1, 128>}, {pipeline_mode = #tpu.pipeline_mode<synchronous>, transform_indices = @transform_4, window_bounds = array<i64: 128, 128>}, {pipeline_mode = #tpu.pipeline_mode<synchronous>, transform_indices = @transform_5, window_bounds = array<i64: 1, 128>}, {pipeline_mode = #tpu.pipeline_mode<synchronous>, transform_indices = @transform_6, window_bounds = array<i64: 128, 128>}, {pipeline_mode = #tpu.pipeline_mode<synchronous>, transform_indices = @transform_7, window_bounds = array<i64: 1, 128>}, {pipeline_mode = #tpu.pipeline_mode<synchronous>, transform_indices = @transform_8, window_bounds = array<i64: 8, 128>}, {pipeline_mode = #tpu.pipeline_mode<synchronous>, transform_indices = @transform_9, window_bounds = array<i64: 8, 128>}]} {
    %c0 = arith.constant 0 : index
    %c0_0 = arith.constant 0 : index
    %0 = vector.load %arg2[%c0, %c0_0] : memref<64x64xbf16, #tpu.memory_space<vmem>>, vector<64x64xbf16>
    %c0_1 = arith.constant 0 : index
    %c0_2 = arith.constant 0 : index
    %1 = vector.load %arg3[%c0_1, %c0_2] : memref<64x32xbf16, #tpu.memory_space<vmem>>, vector<64x32xbf16>
    %cst = arith.constant dense<0.000000e+00> : vector<64x32xf32>
    %2 = tpu.matmul %0, %1, %cst {dimension_numbers = #tpu.dot_dimension_numbers<[1], [0], [0], [1], [0, 0, 1, 1], [], []>} : vector<64x64xbf16>, vector<64x32xbf16>, vector<64x32xf32> -> vector<64x32xf32>
    %3 = arith.truncf %2 : vector<64x32xf32> to vector<64x32xbf16>
    %c0_3 = arith.constant 0 : index
    %c0_4 = arith.constant 0 : index
    %4 = vector.load %arg4[%c0_3, %c0_4] : memref<32x128xbf16, #tpu.memory_space<vmem>>, vector<32x128xbf16>
    %cst_5 = arith.constant dense<0.000000e+00> : vector<64x128xf32>
    %5 = tpu.matmul %3, %4, %cst_5 {dimension_numbers = #tpu.dot_dimension_numbers<[1], [0], [0], [1], [0, 0, 1, 1], [], []>} : vector<64x32xbf16>, vector<32x128xbf16>, vector<64x128xf32> -> vector<64x128xf32>
    %c0_6 = arith.constant 0 : index
    %c0_7 = arith.constant 0 : index
    %6 = vector.load %arg5[%c0_6, %c0_7] : memref<1x128xf32, #tpu.memory_space<vmem>>, vector<1x128xf32>
    %7 = vector.broadcast %6 : vector<1x128xf32> to vector<64x128xf32>
    %8 = arith.addf %5, %7 : vector<64x128xf32>
    %cst_8 = arith.constant 0.000000e+00 : f32
    %9 = vector.broadcast %cst_8 : f32 to vector<64x128xf32>
    %10 = arith.maximumf %8, %9 : vector<64x128xf32>
    %11 = arith.truncf %10 : vector<64x128xf32> to vector<64x128xbf16>
    %12 = tpu.iota {dimensions = array<i32: 0>} : vector<8x64xi32>
    %13 = tpu.iota {dimensions = array<i32: 1>} : vector<8x64xi32>
    %c0_i32 = arith.constant 0 : i32
    %14 = vector.broadcast %c0_i32 : i32 to vector<8x64xi32>
    %c0_i32_9 = arith.constant 0 : i32
    %15 = vector.broadcast %c0_i32_9 : i32 to vector<8x64xi32>
    %16 = arith.cmpi eq, %12, %15 : vector<8x64xi32>
    %c0_10 = arith.constant 0 : index
    %17 = memref.load %arg1[%c0_10] : memref<8xi32, #tpu.memory_space<smem>>
    %c0_i32_11 = arith.constant 0 : i32
    %18 = vector.broadcast %17 : i32 to vector<8x64xi32>
    %19 = vector.broadcast %c0_i32_11 : i32 to vector<8x64xi32>
    %20 = arith.select %16, %18, %19 : vector<8x64xi1>, vector<8x64xi32>
    %21 = arith.addi %14, %20 : vector<8x64xi32>
    %c1_i32 = arith.constant 1 : i32
    %22 = vector.broadcast %c1_i32 : i32 to vector<8x64xi32>
    %23 = arith.cmpi eq, %12, %22 : vector<8x64xi32>
    %c1 = arith.constant 1 : index
    %24 = memref.load %arg1[%c1] : memref<8xi32, #tpu.memory_space<smem>>
    %c0_i32_12 = arith.constant 0 : i32
    %25 = vector.broadcast %24 : i32 to vector<8x64xi32>
    %26 = vector.broadcast %c0_i32_12 : i32 to vector<8x64xi32>
    %27 = arith.select %23, %25, %26 : vector<8x64xi1>, vector<8x64xi32>
    %28 = arith.addi %21, %27 : vector<8x64xi32>
    %c2_i32 = arith.constant 2 : i32
    %29 = vector.broadcast %c2_i32 : i32 to vector<8x64xi32>
    %30 = arith.cmpi eq, %12, %29 : vector<8x64xi32>
    %c2 = arith.constant 2 : index
    %31 = memref.load %arg1[%c2] : memref<8xi32, #tpu.memory_space<smem>>
    %c0_i32_13 = arith.constant 0 : i32
    %32 = vector.broadcast %31 : i32 to vector<8x64xi32>
    %33 = vector.broadcast %c0_i32_13 : i32 to vector<8x64xi32>
    %34 = arith.select %30, %32, %33 : vector<8x64xi1>, vector<8x64xi32>
    %35 = arith.addi %28, %34 : vector<8x64xi32>
    %c3_i32 = arith.constant 3 : i32
    %36 = vector.broadcast %c3_i32 : i32 to vector<8x64xi32>
    %37 = arith.cmpi eq, %12, %36 : vector<8x64xi32>
    %c3 = arith.constant 3 : index
    %38 = memref.load %arg1[%c3] : memref<8xi32, #tpu.memory_space<smem>>
    %c0_i32_14 = arith.constant 0 : i32
    %39 = vector.broadcast %38 : i32 to vector<8x64xi32>
    %40 = vector.broadcast %c0_i32_14 : i32 to vector<8x64xi32>
    %41 = arith.select %37, %39, %40 : vector<8x64xi1>, vector<8x64xi32>
    %42 = arith.addi %35, %41 : vector<8x64xi32>
    %c4_i32 = arith.constant 4 : i32
    %43 = vector.broadcast %c4_i32 : i32 to vector<8x64xi32>
    %44 = arith.cmpi eq, %12, %43 : vector<8x64xi32>
    %c4 = arith.constant 4 : index
    %45 = memref.load %arg1[%c4] : memref<8xi32, #tpu.memory_space<smem>>
    %c0_i32_15 = arith.constant 0 : i32
    %46 = vector.broadcast %45 : i32 to vector<8x64xi32>
    %47 = vector.broadcast %c0_i32_15 : i32 to vector<8x64xi32>
    %48 = arith.select %44, %46, %47 : vector<8x64xi1>, vector<8x64xi32>
    %49 = arith.addi %42, %48 : vector<8x64xi32>
    %c5_i32 = arith.constant 5 : i32
    %50 = vector.broadcast %c5_i32 : i32 to vector<8x64xi32>
    %51 = arith.cmpi eq, %12, %50 : vector<8x64xi32>
    %c5 = arith.constant 5 : index
    %52 = memref.load %arg1[%c5] : memref<8xi32, #tpu.memory_space<smem>>
    %c0_i32_16 = arith.constant 0 : i32
    %53 = vector.broadcast %52 : i32 to vector<8x64xi32>
    %54 = vector.broadcast %c0_i32_16 : i32 to vector<8x64xi32>
    %55 = arith.select %51, %53, %54 : vector<8x64xi1>, vector<8x64xi32>
    %56 = arith.addi %49, %55 : vector<8x64xi32>
    %c6_i32 = arith.constant 6 : i32
    %57 = vector.broadcast %c6_i32 : i32 to vector<8x64xi32>
    %58 = arith.cmpi eq, %12, %57 : vector<8x64xi32>
    %c6 = arith.constant 6 : index
    %59 = memref.load %arg1[%c6] : memref<8xi32, #tpu.memory_space<smem>>
    %c0_i32_17 = arith.constant 0 : i32
    %60 = vector.broadcast %59 : i32 to vector<8x64xi32>
    %61 = vector.broadcast %c0_i32_17 : i32 to vector<8x64xi32>
    %62 = arith.select %58, %60, %61 : vector<8x64xi1>, vector<8x64xi32>
    %63 = arith.addi %56, %62 : vector<8x64xi32>
    %c7_i32 = arith.constant 7 : i32
    %64 = vector.broadcast %c7_i32 : i32 to vector<8x64xi32>
    %65 = arith.cmpi eq, %12, %64 : vector<8x64xi32>
    %c7 = arith.constant 7 : index
    %66 = memref.load %arg1[%c7] : memref<8xi32, #tpu.memory_space<smem>>
    %c0_i32_18 = arith.constant 0 : i32
    %67 = vector.broadcast %66 : i32 to vector<8x64xi32>
    %68 = vector.broadcast %c0_i32_18 : i32 to vector<8x64xi32>
    %69 = arith.select %65, %67, %68 : vector<8x64xi1>, vector<8x64xi32>
    %70 = arith.addi %63, %69 : vector<8x64xi32>
    %71 = arith.cmpi eq, %13, %70 : vector<8x64xi32>
    %72 = arith.extui %71 : vector<8x64xi1> to vector<8x64xi32>
    %73 = arith.sitofp %72 : vector<8x64xi32> to vector<8x64xf32>
    %74 = arith.truncf %73 : vector<8x64xf32> to vector<8x64xbf16>
    %cst_19 = arith.constant dense<0.000000e+00> : vector<8x64xf32>
    %75 = tpu.matmul %74, %0, %cst_19 {dimension_numbers = #tpu.dot_dimension_numbers<[1], [0], [0], [1], [0, 0, 1, 1], [], []>} : vector<8x64xbf16>, vector<64x64xbf16>, vector<8x64xf32> -> vector<8x64xf32>
    %76 = arith.truncf %75 : vector<8x64xf32> to vector<8x64xbf16>
    %cst_20 = arith.constant dense<0.000000e+00> : vector<8x128xf32>
    %77 = tpu.matmul %76, %11, %cst_20 {dimension_numbers = #tpu.dot_dimension_numbers<[1], [0], [0], [1], [0, 0, 1, 1], [], []>} : vector<8x64xbf16>, vector<64x128xbf16>, vector<8x128xf32> -> vector<8x128xf32>
    %78 = arith.truncf %77 : vector<8x128xf32> to vector<8x128xbf16>
    %c0_21 = arith.constant 0 : index
    %c0_22 = arith.constant 0 : index
    %79 = vector.load %arg6[%c0_21, %c0_22] : memref<128x128xbf16, #tpu.memory_space<vmem>>, vector<128x128xbf16>
    %cst_23 = arith.constant dense<0.000000e+00> : vector<8x128xf32>
    %80 = tpu.matmul %78, %79, %cst_23 {dimension_numbers = #tpu.dot_dimension_numbers<[1], [0], [0], [1], [0, 0, 1, 1], [], []>} : vector<8x128xbf16>, vector<128x128xbf16>, vector<8x128xf32> -> vector<8x128xf32>
    %c0_24 = arith.constant 0 : index
    %c0_25 = arith.constant 0 : index
    %81 = vector.load %arg7[%c0_24, %c0_25] : memref<1x128xf32, #tpu.memory_space<vmem>>, vector<1x128xf32>
    %82 = vector.broadcast %81 : vector<1x128xf32> to vector<8x128xf32>
    %83 = arith.addf %80, %82 : vector<8x128xf32>
    %cst_26 = arith.constant 0.000000e+00 : f32
    %84 = vector.broadcast %cst_26 : f32 to vector<8x128xf32>
    %85 = arith.maximumf %83, %84 : vector<8x128xf32>
    %86 = arith.mulf %85, %85 : vector<8x128xf32>
    %cst_27 = arith.constant dense<0.000000e+00> : vector<8xf32>
    %87 = vector.multi_reduction <add>, %86, %cst_27 [1] : vector<8x128xf32> to vector<8xf32>
    %88 = vector.shape_cast %87 : vector<8xf32> to vector<8x1xf32>
    %cst_28 = arith.constant 1.000000e-24 : f32
    %89 = vector.broadcast %cst_28 : f32 to vector<8x1xf32>
    %90 = arith.maximumf %88, %89 : vector<8x1xf32>
    %91 = math.rsqrt %90 : vector<8x1xf32>
    %92 = vector.broadcast %91 : vector<8x1xf32> to vector<8x128xf32>
    %93 = arith.mulf %85, %92 : vector<8x128xf32>
    %c0_29 = arith.constant 0 : index
    %c0_30 = arith.constant 0 : index
    %94 = vector.load %arg11[%c0_29, %c0_30] : memref<8x128xf32, #tpu.memory_space<vmem>>, vector<8x128xf32>
    tpu.vector_store %arg11[%c0_29, %c0_30], %93 {strides = array<i32>} : memref<8x128xf32, #tpu.memory_space<vmem>>, vector<8x128xf32>,
    %95 = arith.truncf %93 : vector<8x128xf32> to vector<8x128xbf16>
    %c0_31 = arith.constant 0 : index
    %c0_32 = arith.constant 0 : index
    %96 = vector.load %arg8[%c0_31, %c0_32] : memref<128x128xbf16, #tpu.memory_space<vmem>>, vector<128x128xbf16>
    %cst_33 = arith.constant dense<0.000000e+00> : vector<8x128xf32>
    %97 = tpu.matmul %95, %96, %cst_33 {dimension_numbers = #tpu.dot_dimension_numbers<[1], [0], [0], [1], [0, 0, 1, 1], [], []>} : vector<8x128xbf16>, vector<128x128xbf16>, vector<8x128xf32> -> vector<8x128xf32>
    %c0_34 = arith.constant 0 : index
    %c0_35 = arith.constant 0 : index
    %98 = vector.load %arg9[%c0_34, %c0_35] : memref<1x128xf32, #tpu.memory_space<vmem>>, vector<1x128xf32>
    %99 = vector.broadcast %98 : vector<1x128xf32> to vector<8x128xf32>
    %100 = arith.addf %97, %99 : vector<8x128xf32>
    %c0_36 = arith.constant 0 : index
    %c0_37 = arith.constant 0 : index
    %101 = vector.load %arg10[%c0_36, %c0_37] : memref<8x128xf32, #tpu.memory_space<vmem>>, vector<8x128xf32>
    tpu.vector_store %arg10[%c0_36, %c0_37], %100 {strides = array<i32>} : memref<8x128xf32, #tpu.memory_space<vmem>>, vector<8x128xf32>,
    return
  }
  func.func @transform_0(%arg0: i32, %arg1: memref<8xi32, #tpu.memory_space<smem>>) -> (i32, i32) {
    %c0_i32 = arith.constant 0 : i32
    %c0_i32_0 = arith.constant 0 : i32
    %c0_i32_1 = arith.constant 0 : i32
    return %c0_i32, %c0_i32_0 : i32, i32
  }
  func.func @transform_1(%arg0: i32, %arg1: memref<8xi32, #tpu.memory_space<smem>>) -> (i32, i32) {
    %c0_i32 = arith.constant 0 : i32
    %c0_i32_0 = arith.constant 0 : i32
    %c0_i32_1 = arith.constant 0 : i32
    return %c0_i32, %c0_i32_0 : i32, i32
  }
  func.func @transform_2(%arg0: i32, %arg1: memref<8xi32, #tpu.memory_space<smem>>) -> (i32, i32) {
    %c0_i32 = arith.constant 0 : i32
    %c0_i32_0 = arith.constant 0 : i32
    %c0_i32_1 = arith.constant 0 : i32
    return %c0_i32, %c0_i32_0 : i32, i32
  }
  func.func @transform_3(%arg0: i32, %arg1: memref<8xi32, #tpu.memory_space<smem>>) -> (i32, i32) {
    %c0_i32 = arith.constant 0 : i32
    %c0_i32_0 = arith.constant 0 : i32
    %c0_i32_1 = arith.constant 0 : i32
    return %c0_i32, %c0_i32_0 : i32, i32
  }
  func.func @transform_4(%arg0: i32, %arg1: memref<8xi32, #tpu.memory_space<smem>>) -> (i32, i32) {
    %c0_i32 = arith.constant 0 : i32
    %c0_i32_0 = arith.constant 0 : i32
    %c0_i32_1 = arith.constant 0 : i32
    return %c0_i32, %c0_i32_0 : i32, i32
  }
  func.func @transform_5(%arg0: i32, %arg1: memref<8xi32, #tpu.memory_space<smem>>) -> (i32, i32) {
    %c0_i32 = arith.constant 0 : i32
    %c0_i32_0 = arith.constant 0 : i32
    %c0_i32_1 = arith.constant 0 : i32
    return %c0_i32, %c0_i32_0 : i32, i32
  }
  func.func @transform_6(%arg0: i32, %arg1: memref<8xi32, #tpu.memory_space<smem>>) -> (i32, i32) {
    %c0_i32 = arith.constant 0 : i32
    %c0_i32_0 = arith.constant 0 : i32
    %c0_i32_1 = arith.constant 0 : i32
    return %c0_i32, %c0_i32_0 : i32, i32
  }
  func.func @transform_7(%arg0: i32, %arg1: memref<8xi32, #tpu.memory_space<smem>>) -> (i32, i32) {
    %c0_i32 = arith.constant 0 : i32
    %c0_i32_0 = arith.constant 0 : i32
    %c0_i32_1 = arith.constant 0 : i32
    return %c0_i32, %c0_i32_0 : i32, i32
  }
  func.func @transform_8(%arg0: i32, %arg1: memref<8xi32, #tpu.memory_space<smem>>) -> (i32, i32) {
    %c0_i32 = arith.constant 0 : i32
    %c0_i32_0 = arith.constant 0 : i32
    %c0_i32_1 = arith.constant 0 : i32
    return %c0_i32, %c0_i32_0 : i32, i32
  }
  func.func @transform_9(%arg0: i32, %arg1: memref<8xi32, #tpu.memory_space<smem>>) -> (i32, i32) {
    %c0_i32 = arith.constant 0 : i32
    %c0_i32_0 = arith.constant 0 : i32
    %c0_i32_1 = arith.constant 0 : i32
    return %c0_i32, %c0_i32_0 : i32, i32
  }
}

</mosaic_0001>

<bundles_post_ra>
// kernel: deep_gnn_forward.1
= control target key start
LH: loop header
LB: loop body
LE: loop exit
PB: predicated region body
PF: predicated region fallthrough
CT: control target
= control target key end

     0   :  { %s744_s16 = smov [#allocation3]   ;;  %s909_s0 = inlined_call_operand.vmem [shape: s32[8], index: 0, kind: input, shape index: {}]   ;;  %s910_s1 = inlined_call_operand.vmem [shape: bf16[64,64], index: 1, kind: input, shape index: {}]   ;;  %s911_s2 = inlined_call_operand.vmem [shape: bf16[64,32], index: 2, kind: input, shape index: {}]   ;;  %s912_s3 = inlined_call_operand.vmem [shape: bf16[32,128], index: 3, kind: input, shape index: {}]   ;;  %s913_s4 = inlined_call_operand.vmem [shape: f32[1,128], index: 4, kind: input, shape index: {}]   ;;  %s914_s5 = inlined_call_operand.vmem [shape: bf16[128,128], index: 5, kind: input, shape index: {}]   ;;  %s915_s6 = inlined_call_operand.vmem [shape: f32[1,128], index: 6, kind: input, shape index: {}]   ;;  %s916_s7 = inlined_call_operand.vmem [shape: bf16[128,128], index: 7, kind: input, shape index: {}]   ;;  %s917_s8 = inlined_call_operand.vmem [shape: f32[1,128], index: 8, kind: input, shape index: {}]   ;;  %s918_s9 = inlined_call_operand.hbm [shape: f32[8,128], index: 9, kind: output, shape index: {0}]   ;;  %s919_s10 = inlined_call_operand.hbm [shape: f32[8,128], index: 10, kind: output, shape index: {1}]  }
   0x1   :  { %s17_s15 = sshll.u32 %s909_s0, 4  ;;  %s18_s15 = int_to_ptr.vmem [resolvable:$true] %s17_s15 }
   0x2   :  { %20 = dma.vmem_to_smem %s18_s15, 16, %s744_s16, [#allocation2] }
   0x3   :  { %738 = dma.done.wait [#allocation2], 16 }
   0x4   :  { %739 = vsyncadd [#allocation2], 4294967280 }
   0x5   :  { %23 = sfence }
   0x6   :  { %24 = vsyncpa [#allocation5], 0  ;;  %v650_v0 = vld [vmem:[%s911_s2 + $0x18] sm:$0xff]  ;;  %v649_v1 = vld [vmem:[%s911_s2 + $0x10] sm:$0xff] }
   0x7   :  { %120 = vmatpush.bf16.msra.mxu0 %v650_v0 }
   0x8   :  { %25 = vsyncpa [#allocation7], 0  ;;  %v648_v2 = vld [vmem:[%s911_s2 + $0x8] sm:$0xff]  ;;  %v647_v3 = vld [vmem:[%s911_s2] sm:$0xff]  ;;  %vm103_vm0 = vcmask 523264   ;;  %vm169_vm1 = vcmask 261120   ;;  %v223_v14 = vlaneseq }
   0x9   :  { %v643_v4 = vld [vmem:[%s910_s1] sm:$0xff]  ;;  %v646_v5 = vld [vmem:[%s910_s1 + $0x18] sm:$0xff]  ;;  %v645_v6 = vld [vmem:[%s910_s1 + $0x10] sm:$0xff]  ;;  %s569_s15 = sld [smem:[#allocation3 + $0x1]]  ;;  %v745_v43 = vmov 0.0   ;;  %s746_s29 = smov [#allocation6]  }
   0xa   :  { %281 = vmatpush.bf16.msra.mxu2 %v646_v5  ;;  %v644_v7 = vld [vmem:[%s910_s1 + $0x8] sm:$0xff]  ;;  %v651_v9 = vld [vmem:[%s912_s3] sm:$0xff]  ;;  %s228_s1 = sld [smem:[#allocation3]]  ;;  %v224_v15 = vshrl.u32 %v223_v14, 7  ;;  %v226_v40 = vand.u32 127, %v223_v14  ;;  %v660_v59 = vld [vmem:[%s914_s5 + $0x38] sm:$0xff] }
   0xb   :  { %121 = vmatpush.bf16.msra.mxu0 %v649_v1  ;;  %v652_v8 = vld [vmem:[%s912_s3 + $0x8] sm:$0xff]  ;;  %s570_s16 = sld [smem:[#allocation3 + $0x2]]  ;;  %v659_v61 = vld [vmem:[%s914_s5 + $0x30] sm:$0xff]  ;;  %v673_v63 = vld [vmem:[%s913_s4] ss:$0 sm:$0xff]  ;;  %s507_s4 = sshll.u32 %s919_s10, 4  ;;  %s508_s4 = int_to_ptr.hbm [resolvable:$true] %s507_s4 }
   0xc   :  { %188 = vmatpush.bf16.msra.mxu1 %v652_v8  ;;  %s571_s17 = sld [smem:[#allocation3 + $0x3]]  ;;  %vm227_vm2 = vcmp.eq.s32.totalorder %v224_v15, 0  ;;  %vm231_vm3 = vcmp.eq.s32.totalorder %v224_v15, 1  ;;  %vm236_vm4 = vcmp.eq.s32.totalorder %v224_v15, 2  ;;  %vm241_vm5 = vcmp.eq.s32.totalorder %v224_v15, 3  ;;  %v658_v62 = vld [vmem:[%s914_s5 + $0x28] sm:$0xff] }
   0xd   :  { %s572_s18 = sld [smem:[#allocation3 + $0x4]]  ;;  %vm246_vm6 = vcmp.eq.s32.totalorder %v224_v15, 4  ;;  %vm251_vm7 = vcmp.eq.s32.totalorder %v224_v15, 5  ;;  %vm256_vm8 = vcmp.eq.s32.totalorder %v224_v15, 6  ;;  %vm261_vm9 = vcmp.eq.s32.totalorder %v224_v15, 7  ;;  %v656_v8 = vld [vmem:[%s914_s5 + $0x18] sm:$0xff] }
   0xe   :  { %282 = vmatpush.bf16.msra.mxu2 %v645_v6  ;;  %s573_s19 = sld [smem:[#allocation3 + $0x5]]  ;;  %v655_v14 = vld [vmem:[%s914_s5 + $0x10] sm:$0xff]  ;;  %s747_s13 = smov [#allocation4]  }
   0xf   :  { %122 = vmatpush.bf16.msra.mxu0 %v648_v2  ;;  %v233_v17 = vstv %s569_s15  ;;  %s574_s3 = sld [smem:[#allocation3 + $0x6]]  ;;  %v657_v2 = vld [vmem:[%s914_s5 + $0x20] sm:$0xff]  ;;  %s494_s14 = sshll.u32 %s747_s13, 4  ;;  %s495_s14 = int_to_ptr.vmem [resolvable:$true] %s494_s14 }
  0x10   :  { %189 = vmatpush.bf16.msra.mxu1 %v651_v9  ;;  %v229_v16 = vstv %s228_s1  ;;  %v234_v19 = vsel %vm231_vm3, %v233_v17, 0  ;;  %s575_s20 = sld [smem:[#allocation3 + $0x7]] }
  0x11   :  { %v230_v18 = vsel %vm227_vm2, %v229_v16, 0  ;;  %v238_v21 = vstv %s570_s16  ;;  %s496_s16 = sshll.u32 %s918_s9, 4  ;;  %s497_s16 = int_to_ptr.hbm [resolvable:$true] %s496_s16 }
  0x12   :  { %283 = vmatpush.bf16.msra.mxu2 %v644_v7  ;;  %v235_v20 = vadd.s32 %v234_v19, %v230_v18  ;;  %v239_v22 = vsel %vm236_vm4, %v238_v21, 0  ;;  %v243_v25 = vstv %s571_s17 }
  0x13   :  { %123 = vmatpush.bf16.msra.mxu0 %v647_v3  ;;  %v244_v27 = vsel %vm241_vm5, %v243_v25, 0  ;;  %v248_v29 = vstv %s572_s18 }
  0x14   :  { %v240_v24 = vadd.s32 %v239_v22, %v235_v20  ;;  %v249_v30 = vsel %vm246_vm6, %v248_v29, 0  ;;  %v253_v31 = vstv %s573_s19  ;;  %v654_v20 = vld [vmem:[%s914_s5 + $0x8] sm:$0xff] }
  0x15   :  { %v254_v33 = vsel %vm251_vm7, %v253_v31, 0  ;;  %v258_v34 = vstv %s574_s3  ;;  %v667_v31 = vld [vmem:[%s916_s7 + $0x30] sm:$0xff] }
  0x16   :  { %553 = vmatmul.msk.bf16.vlgmr.msra.gmra.mxu0 %vm103_vm0, %v643_v4  ;;  %284 = vmatpush.bf16.msra.mxu2 %v643_v4  ;;  %v245_v28 = vadd.s32 %v244_v27, %v240_v24  ;;  %v259_v35 = vsel %vm256_vm8, %v258_v34, 0  ;;  %v263_v36 = vstv %s575_s20 }
  0x17   :  { %v264_v38 = vsel %vm261_vm9, %v263_v36, 0 }
  0x18   :  { %v250_v32 = vadd.s32 %v249_v30, %v245_v28  ;;  %v668_v30 = vld [vmem:[%s916_s7 + $0x38] sm:$0xff] }
  0x1a   :  { %v255_v37 = vadd.s32 %v254_v33, %v250_v32  ;;  %376 = vmatpush.bf16.msrb.mxu2 %v660_v59  ;;  %v674_v32 = vld [vmem:[%s915_s6] ss:$0 sm:$0xff] }
  0x1c   :  { %v260_v41 = vadd.s32 %v259_v35, %v255_v37 }
  0x1e   :  { %v265_v42 = vadd.s32 %v264_v38, %v260_v41  ;;  %377 = vmatpush.bf16.msrb.mxu2 %v659_v61  ;;  %v666_v38 = vld [vmem:[%s916_s7 + $0x28] sm:$0xff]  ;;  %v663_v41 = vld [vmem:[%s916_s7 + $0x10] sm:$0xff] }
  0x20   :  { %vm266_vm10 = vcmp.eq.s32.totalorder %v226_v40, %v265_v42  ;;  %v664_v40 = vld [vmem:[%s916_s7 + $0x18] sm:$0xff]  ;;  %v662_v42 = vld [vmem:[%s916_s7 + $0x8] sm:$0xff] }
  0x21   :  { %v576_v44 = vsel %vm266_vm10, 1.0, %v745_v43  ;;  %v661_v43 = vld [vmem:[%s916_s7] sm:$0xff] }
  0x22   :  { %v269_v45 = vpack.c.bf16 %v576_v44, %v576_v44  ;;  %378 = vmatpush.bf16.msrb.mxu2 %v658_v62 }
  0x24   :  { %577 = vmatmul.msk.bf16.vlgmr.msra.gmra.mxu2 %vm103_vm0, %v269_v45 }
  0x26   :  { %554 = vmatmul.msk.bf16.gmra.mxu0 %vm103_vm0, %v644_v7  ;;  %379 = vmatpush.bf16.msrb.mxu2 %v657_v2 }
  0x2a   :  { %380 = vmatpush.bf16.msrb.mxu2 %v656_v8 }
  0x2e   :  { %381 = vmatpush.bf16.msrb.mxu2 %v655_v14 }
  0x32   :  { %382 = vmatpush.bf16.msrb.mxu2 %v654_v20 }
  0x36   :  { %555 = vmatmul.msk.bf16.gmra.mxu0 %vm103_vm0, %v645_v6 }
  0x46   :  { %556 = vmatmul.msk.bf16.gmra.mxu0 %vm103_vm0, %v646_v5 }
  0x93   :  { %v125_v10 = vpop.f32.mrf.mxu0 }
  0x9b   :  { %v127_v11 = vpop.f32.mrf.mxu0 }
  0x9c   :  { %v145_v12 = vpack.c.bf16 %v127_v11, %v125_v10 }
  0x9e   :  { %565 = vmatmul.msk.bf16.vlgmr.msra.gmra.mxu1 %vm169_vm1, %v145_v12 }
  0xa3   :  { %v130_v13 = vpop.f32.mrf.mxu0 }
  0xa7   :  { %v286_v56 = vpop.f32.mrf.mxu2 }
  0xa8   :  { %v290_v25 = vpack.c.bf16 %v286_v56, %v286_v56 }
  0xab   :  { %v132_v23 = vpop.f32.mrf.mxu0 }
  0xac   :  { %v146_v26 = vpack.c.bf16 %v132_v23, %v130_v13 }
  0xae   :  { %566 = vmatmul.msk.bf16.gmra.mxu1 %vm169_vm1, %v146_v26  ;;  %v653_v26 = vld [vmem:[%s914_s5] sm:$0xff] }
  0xaf   :  { %v288_v58 = vpop.f32.mrf.mxu2  ;;  %383 = vmatpush.bf16.msrb.mxu2 %v653_v26 }
  0xb3   :  { %v135_v39 = vpop.f32.mrf.mxu0 }
  0xbb   :  { %v137_v46 = vpop.f32.mrf.mxu0 }
  0xbc   :  { %v147_v47 = vpack.c.bf16 %v137_v46, %v135_v39  ;;  %v665_v39 = vld [vmem:[%s916_s7 + $0x20] sm:$0xff]  ;;  %s505_s7 = sshll.u32 %s746_s29, 4  ;;  %s506_s7 = int_to_ptr.vmem [resolvable:$true] %s505_s7 }
  0xbe   :  { %567 = vmatmul.msk.bf16.gmra.mxu1 %vm169_vm1, %v147_v47 }
  0xc3   :  { %v140_v48 = vpop.f32.mrf.mxu0 }
  0xcb   :  { %v142_v49 = vpop.f32.mrf.mxu0 }
  0xcc   :  { %v148_v50 = vpack.c.bf16 %v142_v49, %v140_v48 }
  0xce   :  { %568 = vmatmul.msk.bf16.gmra.mxu1 %vm169_vm1, %v148_v50 }
 0x11b   :  { %v191_v51 = vpop.f32.mrf.mxu1 }
 0x11c   :  { %v192_v18 = vadd.f32 %v673_v63, %v191_v51 }
 0x11e   :  { %v211_v23 = vmax.f32 %v192_v18, 0.0 }
 0x123   :  { %v193_v52 = vpop.f32.mrf.mxu1 }
 0x124   :  { %v194_v15 = vadd.f32 %v673_v63, %v193_v52 }
 0x126   :  { %v212_v21 = vmax.f32 %v194_v15, 0.0 }
 0x128   :  { %v219_v24 = vpack.c.bf16 %v212_v21, %v211_v23 }
 0x12b   :  { %v196_v53 = vpop.f32.mrf.mxu1 }
 0x12c   :  { %v197_v12 = vadd.f32 %v673_v63, %v196_v53 }
 0x12e   :  { %v213_v19 = vmax.f32 %v197_v12, 0.0 }
 0x133   :  { %v198_v54 = vpop.f32.mrf.mxu1 }
 0x134   :  { %v199_v9 = vadd.f32 %v673_v63, %v198_v54 }
 0x136   :  { %v214_v16 = vmax.f32 %v199_v9, 0.0 }
 0x138   :  { %v220_v22 = vpack.c.bf16 %v214_v16, %v213_v19 }
 0x13b   :  { %v201_v55 = vpop.f32.mrf.mxu1 }
 0x13c   :  { %v202_v5 = vadd.f32 %v673_v63, %v201_v55  ;;  %v675_v55 = vld [vmem:[%s917_s8] ss:$0 sm:$0xff] }
 0x13e   :  { %v215_v13 = vmax.f32 %v202_v5, 0.0 }
 0x143   :  { %v203_v57 = vpop.f32.mrf.mxu1 }
 0x144   :  { %v204_v3 = vadd.f32 %v673_v63, %v203_v57 }
 0x146   :  { %v216_v10 = vmax.f32 %v204_v3, 0.0 }
 0x148   :  { %v221_v17 = vpack.c.bf16 %v216_v10, %v215_v13 }
 0x14b   :  { %v206_v60 = vpop.f32.mrf.mxu1 }
 0x14c   :  { %v207_v0 = vadd.f32 %v673_v63, %v206_v60 }
 0x14e   :  { %v217_v6 = vmax.f32 %v207_v0, 0.0 }
 0x153   :  { %v208_v1 = vpop.f32.mrf.mxu1 }
 0x154   :  { %v209_v4 = vadd.f32 %v673_v63, %v208_v1 }
 0x156   :  { %v218_v7 = vmax.f32 %v209_v4, 0.0 }
 0x158   :  { %v222_v11 = vpack.c.bf16 %v218_v7, %v217_v6 }
 0x15a   :  { %298 = vmatpush.bf16.msra.mxu3 %v222_v11 }
 0x15e   :  { %299 = vmatpush.bf16.msra.mxu3 %v221_v17 }
 0x162   :  { %300 = vmatpush.bf16.msra.mxu3 %v220_v22 }
 0x166   :  { %301 = vmatpush.bf16.msra.mxu3 %v219_v24 }
 0x169   :  { %578 = vmatmul.msk.bf16.vlgmr.msra.gmra.mxu3 %vm103_vm0, %v290_v25 }
 0x16a   :  { %475 = vmatpush.bf16.msrb.mxu3 %v668_v30 }
 0x16e   :  { %476 = vmatpush.bf16.msrb.mxu3 %v667_v31 }
 0x172   :  { %477 = vmatpush.bf16.msrb.mxu3 %v666_v38 }
 0x176   :  { %478 = vmatpush.bf16.msrb.mxu3 %v665_v39 }
 0x17a   :  { %479 = vmatpush.bf16.msrb.mxu3 %v664_v40 }
 0x17e   :  { %480 = vmatpush.bf16.msrb.mxu3 %v663_v41 }
 0x182   :  { %481 = vmatpush.bf16.msrb.mxu3 %v662_v42 }
 0x186   :  { %482 = vmatpush.bf16.msrb.mxu3 %v661_v43 }
 0x1ec   :  { %v303_v27 = vpop.f32.mrf.mxu3 }
 0x1ed   :  { %v307_v28 = vpack.c.bf16 %v303_v27, %v303_v27 }
 0x1ef   :  { %384 = vmatmul.bf16.vlgmr.msrb.gmra.mxu2 %v307_v28 }
 0x1f4   :  { %v305_v29 = vpop.f32.mrf.mxu3 }
 0x272   :  { %v385_v33 = vpop.f32.mrf.mxu2 }
 0x273   :  { %v386_v34 = vadd.f32 %v674_v32, %v385_v33 }
 0x275   :  { %v389_v35 = vmax.f32 %v386_v34, 0.0 }
 0x277   :  { %v390_v36 = vmul.f32 %v389_v35, %v389_v35 }
 0x279   :  { %391 = vadd.xlane.f32.xlu0 %v390_v36 }
 0x27a   :  { %v387_v37 = vpop.f32.mrf.mxu2 }
 0x2ec   :  { %v392_v44 = vpop.xlane.xlu0 %391 }
 0x2ed   :  { %v393_v45 = vmax.f32 %v392_v44, 1e-24 }
 0x2ef   :  { %676 = vrsqrt.f32 %v393_v45  ;;  %vm400_vm12 = vweird.f32 %v393_v45 }
 0x2f5   :  { %v677_v46 = vpop.eup %676 }
 0x2f6   :  { %v395_v47 = vmul.f32 %v677_v46, %v393_v45  ;;  %vm401_vm11 = vweird.f32 %v677_v46 }
 0x2f7   :  { %vm402_vm13 = vmor %vm400_vm12, %vm401_vm11 }
 0x2f8   :  { %v396_v48 = vmul.f32 %v677_v46, %v395_v47 }
 0x2fa   :  { %v397_v49 = vmul.f32 0.5, %v396_v48 }
 0x2fc   :  { %v398_v50 = vsub.f32 1.5, %v397_v49 }
 0x2fe   :  { %v399_v51 = vmul.f32 %v677_v46, %v398_v50 }
 0x300   :  { %v403_v52 = vsel %vm402_vm13, %v677_v46, %v399_v51 }
 0x301   :  { %v404_v53 = vmul.f32 %v403_v52, %v389_v35 }
 0x303   :  { %v406_v54 = vpack.c.bf16 %v404_v53, %v404_v53  ;;  %405 = vst [vmem:[#allocation6] sm:$0xff] %v404_v53 }
 0x304   :  { %510 = dma.vmem_to_hbm [thread:$0]  %s506_s7, 128, %s508_s4, [#allocation7]  }
 0x305   :  { %483 = vmatmul.bf16.vlgmr.msrb.gmra.mxu3 %v406_v54 }
 0x388   :  { %v484_v56 = vpop.f32.mrf.mxu3 }
 0x389   :  { %v485_v57 = vadd.f32 %v675_v55, %v484_v56 }
 0x38b   :  { %488 = vst [vmem:[#allocation4] sm:$0xff] %v485_v57 }
 0x38c   :  { %499 = dma.vmem_to_hbm [thread:$0]  %s495_s14, 128, %s497_s16, [#allocation5]  }
 0x390   :  { %v486_v58 = vpop.f32.mrf.mxu3 }
 0x391   :  { %740 = dma.done.wait [#allocation5], 128  }
 0x392   :  { %741 = vsyncadd [#allocation5], 4294967168 }
 0x393   :  { %742 = dma.done.wait [#allocation7], 128  }
 0x394   :  { %743 = vsyncadd [#allocation7], 4294967168 }
 0x395   :  { %519 = vsyncpa [#allocation5], 1 }
 0x396   :  { %520 = vsyncpa [#allocation7], 1 }

</bundles_post_ra>
